<compile_context>
chip_gen: v7x
topology: tpu7x:2x2x1
jax: 0.10.0
libtpu: 0.0.40
codegen_flags: <defaults>
</compile_context>

<pallas_src>
import functools

import jax
import jax.numpy as jnp
from jax.experimental import pallas as pl
from jax.experimental.pallas import tpu as pltpu


def _round_up(n, m):
    return ((n + m - 1) // m) * m


def mlp_kernel(x_ref, w1_ref, b1_ref, w2_ref, b2_ref, w3_ref, b3_ref, o_ref):
    """Fused 3x (Linear + ReLU) on one batch tile.

    x_ref:  (TB, 10) f32, batch-major (exactly as stored in HBM)
    w*_ref: (in, out) bf16  (pre-transposed tiny weights, VMEM-resident)
    b*_ref: (1, out)  f32   (VMEM-resident)
    o_ref:  (TB, 10) f32
    """
    h = jnp.dot(x_ref[...].astype(jnp.bfloat16), w1_ref[...],
                preferred_element_type=jnp.float32)
    h = jnp.maximum(h + b1_ref[...], 0.0)
    h = jnp.dot(h.astype(jnp.bfloat16), w2_ref[...],
                preferred_element_type=jnp.float32)
    h = jnp.maximum(h + b2_ref[...], 0.0)
    h = jnp.dot(h.astype(jnp.bfloat16), w3_ref[...],
                preferred_element_type=jnp.float32)
    o_ref[...] = jnp.maximum(h + b3_ref[...], 0.0).astype(o_ref.dtype)


def _choose_tile(batch, max_tile):
    """Pick the batch tile TB.

    Large batch: aim for >= ~8 grid steps (keeps both v7x TCs fed and the DMA
    pipeline busy), multiple of 512 for full 256-wide MXU column tiles.
    Small batch: a single step covering everything, rounded to the sublane
    width (8) so the BlockSpec second-minor constraint holds.
    """
    if batch <= 0:
        return 8
    target = max(512, _round_up(-(-batch // 8), 512))
    tb = min(max_tile, target)
    if tb >= batch:
        tb = _round_up(batch, 8)
    return tb


@functools.partial(jax.jit, static_argnames=("max_tile",))
def sequential_with_duplicated_module(x, params, *, max_tile=8192):
    """x: (B, 10) float32.  params: dict name -> (W, b) in PyTorch layout
    (W: (out, in), b: (out,)).  Returns (B, 10) float32."""
    (w1, b1), (w2, b2), (w3, b3) = params["l1"], params["l2"], params["l3"]
    B, f_in = x.shape
    f_out = w3.shape[0]

    tb = _choose_tile(B, max_tile)
    b_pad = _round_up(B, tb)
    grid = (b_pad // tb,)

    # Pad only when B doesn't divide into tiles (adds at most one tile; no-op
    # and no copy for batch sizes that already divide).
    x_p = x if b_pad == B else jnp.pad(x, ((0, b_pad - B), (0, 0)))

    # Tiny (<= 1.6 KB) weight transposes / bf16 casts; negligible HBM work.
    w1t = w1.T.astype(jnp.bfloat16)
    w2t = w2.T.astype(jnp.bfloat16)
    w3t = w3.T.astype(jnp.bfloat16)
    b1r, b2r, b3r = b1[None, :], b2[None, :], b3[None, :]   # (1, out), f32

    def resident(arr):
        # Whole array, same block every grid step -> stays VMEM-resident.
        return pl.BlockSpec(arr.shape, lambda i: (0, 0))

    out = pl.pallas_call(
        mlp_kernel,
        out_shape=jax.ShapeDtypeStruct((b_pad, f_out), jnp.float32),
        grid=grid,
        in_specs=[
            pl.BlockSpec((tb, f_in), lambda i: (i, 0)),   # x tile, batch-major
            resident(w1t), resident(b1r),
            resident(w2t), resident(b2r),
            resident(w3t), resident(b3r),
        ],
        out_specs=pl.BlockSpec((tb, f_out), lambda i: (i, 0)),
        compiler_params=pltpu.CompilerParams(
            dimension_semantics=("parallel",),
            # ~30 MiB actual usage at max_tile=8192; keep headroom under
            # v7x's 64 MiB physical VMEM (fits v5e/v6e trivially).
            vmem_limit_bytes=48 * 1024 * 1024,
        ),
    )(x_p, w1t, b1r, w2t, b2r, w3t, b3r)

    # Padded rows contain ReLU(bias) garbage; slice them off (no-op if unpadded).
    return out if b_pad == B else out[:B]


def init_params(key):
    """Deterministic init matching nn.Linear shapes (out, in)."""
    shapes = {"l1": (20, 10), "l2": (20, 20), "l3": (10, 20)}
    params = {}
    for name, (out_f, in_f) in shapes.items():
        key, kw, kb = jax.random.split(key, 3)
        bound = 1.0 / (in_f ** 0.5)  # PyTorch default uniform init scheme
        w = jax.random.uniform(kw, (out_f, in_f), jnp.float32, -bound, bound)
        b = jax.random.uniform(kb, (out_f,), jnp.float32, -bound, bound)
        params[name] = (w, b)
    return params


def reference(x, params):
    """Pure-f32 reference of the PyTorch forward."""
    h = x
    for name in ("l1", "l2", "l3"):
        w, b = params[name]
        h = jnp.maximum(h @ w.T + b, 0.0)
    return h


if __name__ == "__main__":
    key = jax.random.PRNGKey(0)
    kx, kp = jax.random.split(key)
    params = init_params(kp)

    # Small batch, deliberately NOT a multiple of 8/128 to exercise padding.
    B = 100
    x = jax.random.normal(kx, (B, 10), jnp.float32)

    y = sequential_with_duplicated_module(x, params)
    y = jax.block_until_ready(y)

    y_ref = reference(x, params)
    assert y.shape == (B, 10)
    # Kernel uses bf16 MXU operands (f32 accumulation) -> compare with a
    # correspondingly relaxed tolerance against the f32 reference.
    assert jnp.allclose(y, y_ref, atol=2e-2, rtol=2e-2)
    print("KERNEL_OK")
</pallas_src>

<mosaic_0001>
module attributes {stable_mosaic.version = 11 : i64} {
  func.func @mlp_kernel(%arg0: i32, %arg1: memref<104x10xf32, #tpu.memory_space<vmem>>, %arg2: memref<10x20xbf16, #tpu.memory_space<vmem>>, %arg3: memref<1x20xf32, #tpu.memory_space<vmem>>, %arg4: memref<20x20xbf16, #tpu.memory_space<vmem>>, %arg5: memref<1x20xf32, #tpu.memory_space<vmem>>, %arg6: memref<20x10xbf16, #tpu.memory_space<vmem>>, %arg7: memref<1x10xf32, #tpu.memory_space<vmem>>, %arg8: memref<104x10xf32, #tpu.memory_space<vmem>>) attributes {dimension_semantics = [#tpu.dimension_semantics<parallel>], iteration_bounds = array<i64: 1>, scalar_prefetch = 0 : i64, scratch_operands = 0 : i64, tpu.core_type = #tpu.core_type<tc>, window_params = [{transform_indices = @transform_0, window_bounds = array<i64: 104, 10>}, {pipeline_mode = #tpu.pipeline_mode<synchronous>, transform_indices = @transform_1, window_bounds = array<i64: 10, 20>}, {pipeline_mode = #tpu.pipeline_mode<synchronous>, transform_indices = @transform_2, window_bounds = array<i64: 1, 20>}, {pipeline_mode = #tpu.pipeline_mode<synchronous>, transform_indices = @transform_3, window_bounds = array<i64: 20, 20>}, {pipeline_mode = #tpu.pipeline_mode<synchronous>, transform_indices = @transform_4, window_bounds = array<i64: 1, 20>}, {pipeline_mode = #tpu.pipeline_mode<synchronous>, transform_indices = @transform_5, window_bounds = array<i64: 20, 10>}, {pipeline_mode = #tpu.pipeline_mode<synchronous>, transform_indices = @transform_6, window_bounds = array<i64: 1, 10>}, {transform_indices = @transform_7, window_bounds = array<i64: 104, 10>}]} {
    %c0 = arith.constant 0 : index
    %c0_0 = arith.constant 0 : index
    %0 = vector.load %arg1[%c0, %c0_0] : memref<104x10xf32, #tpu.memory_space<vmem>>, vector<104x10xf32>
    %1 = arith.truncf %0 : vector<104x10xf32> to vector<104x10xbf16>
    %c0_1 = arith.constant 0 : index
    %c0_2 = arith.constant 0 : index
    %2 = vector.load %arg2[%c0_1, %c0_2] : memref<10x20xbf16, #tpu.memory_space<vmem>>, vector<10x20xbf16>
    %cst = arith.constant dense<0.000000e+00> : vector<104x20xf32>
    %3 = tpu.matmul %1, %2, %cst {dimension_numbers = #tpu.dot_dimension_numbers<[1], [0], [0], [1], [0, 0, 1, 1], [], []>} : vector<104x10xbf16>, vector<10x20xbf16>, vector<104x20xf32> -> vector<104x20xf32>
    %c0_3 = arith.constant 0 : index
    %c0_4 = arith.constant 0 : index
    %4 = vector.load %arg3[%c0_3, %c0_4] : memref<1x20xf32, #tpu.memory_space<vmem>>, vector<1x20xf32>
    %5 = vector.broadcast %4 : vector<1x20xf32> to vector<104x20xf32>
    %6 = arith.addf %3, %5 : vector<104x20xf32>
    %cst_5 = arith.constant 0.000000e+00 : f32
    %7 = vector.broadcast %cst_5 : f32 to vector<104x20xf32>
    %8 = arith.maximumf %6, %7 : vector<104x20xf32>
    %9 = arith.truncf %8 : vector<104x20xf32> to vector<104x20xbf16>
    %c0_6 = arith.constant 0 : index
    %c0_7 = arith.constant 0 : index
    %10 = vector.load %arg4[%c0_6, %c0_7] : memref<20x20xbf16, #tpu.memory_space<vmem>>, vector<20x20xbf16>
    %cst_8 = arith.constant dense<0.000000e+00> : vector<104x20xf32>
    %11 = tpu.matmul %9, %10, %cst_8 {dimension_numbers = #tpu.dot_dimension_numbers<[1], [0], [0], [1], [0, 0, 1, 1], [], []>} : vector<104x20xbf16>, vector<20x20xbf16>, vector<104x20xf32> -> vector<104x20xf32>
    %c0_9 = arith.constant 0 : index
    %c0_10 = arith.constant 0 : index
    %12 = vector.load %arg5[%c0_9, %c0_10] : memref<1x20xf32, #tpu.memory_space<vmem>>, vector<1x20xf32>
    %13 = vector.broadcast %12 : vector<1x20xf32> to vector<104x20xf32>
    %14 = arith.addf %11, %13 : vector<104x20xf32>
    %cst_11 = arith.constant 0.000000e+00 : f32
    %15 = vector.broadcast %cst_11 : f32 to vector<104x20xf32>
    %16 = arith.maximumf %14, %15 : vector<104x20xf32>
    %17 = arith.truncf %16 : vector<104x20xf32> to vector<104x20xbf16>
    %c0_12 = arith.constant 0 : index
    %c0_13 = arith.constant 0 : index
    %18 = vector.load %arg6[%c0_12, %c0_13] : memref<20x10xbf16, #tpu.memory_space<vmem>>, vector<20x10xbf16>
    %cst_14 = arith.constant dense<0.000000e+00> : vector<104x10xf32>
    %19 = tpu.matmul %17, %18, %cst_14 {dimension_numbers = #tpu.dot_dimension_numbers<[1], [0], [0], [1], [0, 0, 1, 1], [], []>} : vector<104x20xbf16>, vector<20x10xbf16>, vector<104x10xf32> -> vector<104x10xf32>
    %c0_15 = arith.constant 0 : index
    %c0_16 = arith.constant 0 : index
    %20 = vector.load %arg7[%c0_15, %c0_16] : memref<1x10xf32, #tpu.memory_space<vmem>>, vector<1x10xf32>
    %21 = vector.broadcast %20 : vector<1x10xf32> to vector<104x10xf32>
    %22 = arith.addf %19, %21 : vector<104x10xf32>
    %cst_17 = arith.constant 0.000000e+00 : f32
    %23 = vector.broadcast %cst_17 : f32 to vector<104x10xf32>
    %24 = arith.maximumf %22, %23 : vector<104x10xf32>
    %c0_18 = arith.constant 0 : index
    %c0_19 = arith.constant 0 : index
    %25 = vector.load %arg8[%c0_18, %c0_19] : memref<104x10xf32, #tpu.memory_space<vmem>>, vector<104x10xf32>
    tpu.vector_store %arg8[%c0_18, %c0_19], %24 {strides = array<i32>} : memref<104x10xf32, #tpu.memory_space<vmem>>, vector<104x10xf32>,
    return
  }
  func.func @transform_0(%arg0: i32) -> (i32, i32) {
    %c0_i32 = arith.constant 0 : i32
    %c0_i32_0 = arith.constant 0 : i32
    return %arg0, %c0_i32 : i32, i32
  }
  func.func @transform_1(%arg0: i32) -> (i32, i32) {
    %c0_i32 = arith.constant 0 : i32
    %c0_i32_0 = arith.constant 0 : i32
    %c0_i32_1 = arith.constant 0 : i32
    return %c0_i32, %c0_i32_0 : i32, i32
  }
  func.func @transform_2(%arg0: i32) -> (i32, i32) {
    %c0_i32 = arith.constant 0 : i32
    %c0_i32_0 = arith.constant 0 : i32
    %c0_i32_1 = arith.constant 0 : i32
    return %c0_i32, %c0_i32_0 : i32, i32
  }
  func.func @transform_3(%arg0: i32) -> (i32, i32) {
    %c0_i32 = arith.constant 0 : i32
    %c0_i32_0 = arith.constant 0 : i32
    %c0_i32_1 = arith.constant 0 : i32
    return %c0_i32, %c0_i32_0 : i32, i32
  }
  func.func @transform_4(%arg0: i32) -> (i32, i32) {
    %c0_i32 = arith.constant 0 : i32
    %c0_i32_0 = arith.constant 0 : i32
    %c0_i32_1 = arith.constant 0 : i32
    return %c0_i32, %c0_i32_0 : i32, i32
  }
  func.func @transform_5(%arg0: i32) -> (i32, i32) {
    %c0_i32 = arith.constant 0 : i32
    %c0_i32_0 = arith.constant 0 : i32
    %c0_i32_1 = arith.constant 0 : i32
    return %c0_i32, %c0_i32_0 : i32, i32
  }
  func.func @transform_6(%arg0: i32) -> (i32, i32) {
    %c0_i32 = arith.constant 0 : i32
    %c0_i32_0 = arith.constant 0 : i32
    %c0_i32_1 = arith.constant 0 : i32
    return %c0_i32, %c0_i32_0 : i32, i32
  }
  func.func @transform_7(%arg0: i32) -> (i32, i32) {
    %c0_i32 = arith.constant 0 : i32
    %c0_i32_0 = arith.constant 0 : i32
    return %arg0, %c0_i32 : i32, i32
  }
}

</mosaic_0001>

<bundles_post_ra>
// kernel: sequential_with_duplicated_module.1
= control target key start
LH: loop header
LB: loop body
LE: loop exit
PB: predicated region body
PF: predicated region fallthrough
CT: control target
= control target key end

     0   :  { %vm83_vm0 = vcmask 1044480   ;;  %v667_v0 = vmov 0.0   ;;  %vm668_vm1 = vmmov 0   ;;  %vm61_vm2 = vcmask 80896   ;;  %s940_s1 = inlined_call_operand.vmem [shape: bf16[10,20], index: 1, kind: input, shape index: {}]   ;;  %s941_s0 = inlined_call_operand.vmem [shape: f32[104,10], index: 0, kind: input, shape index: {}]   ;;  %s942_s3 = inlined_call_operand.vmem [shape: bf16[20,20], index: 3, kind: input, shape index: {}]   ;;  %s943_s5 = inlined_call_operand.vmem [shape: bf16[20,10], index: 5, kind: input, shape index: {}]   ;;  %s944_s2 = inlined_call_operand.vmem [shape: f32[1,20], index: 2, kind: input, shape index: {}]   ;;  %s945_s4 = inlined_call_operand.vmem [shape: f32[1,20], index: 4, kind: input, shape index: {}]   ;;  %s946_s6 = inlined_call_operand.vmem [shape: f32[1,10], index: 6, kind: input, shape index: {}]   ;;  %s947_s7 = inlined_call_operand.vmem [shape: f32[104,10], index: 7, kind: output, shape index: {}]  }
   0x1   :  { %564 = vmatprep.subr.bf16.mxu0 %v667_v0  ;;  %v662_v1 = vld [vmem:[%s940_s1] sm:$0x1f]   ;;  %566 = vmatprep.mubr.msk.bf16.mxu0 %vm668_vm1, %v667_v0  ;;  %v28_v3 = vld [vmem:[%s941_s0 + $0x8] sm:$0xff]  ;;  %vm236_vm3 = vcmask 1041408   ;;  %v29_v11 = vld [vmem:[%s941_s0 + $0x10] sm:$0xff]  ;;  %vm214_vm4 = vcmask 162816  }
   0x2   :  { %v27_v2 = vld [vmem:[%s941_s0] sm:$0xff]  ;;  %658 = vmatprep.subr.bf16.mxu1 %v667_v0  ;;  %582 = vmatprep.mubr.msk.bf16.mxu1 %vm668_vm1, %v667_v0  ;;  %v85_v4 = vsel %vm83_vm0, %v662_v1, 0  ;;  %v36_v7 = vld [vmem:[%s941_s0 + $0x48] sm:$0xff]  ;;  %v30_v12 = vld [vmem:[%s941_s0 + $0x18] sm:$0xff] }
   0x3   :  { %v40_v5 = vpack.c.bf16 %v28_v3, %v27_v2  ;;  %565 = vmatpush3.bf16.msra.mxu0 %v85_v4  ;;  %659 = vmatpush3.bf16.msra.mxu1 %v85_v4  ;;  %v35_v6 = vld [vmem:[%s941_s0 + $0x40] sm:$0xff]  ;;  %v664_v10 = vld [vmem:[%s942_s3 + $0x8] ss:$0 sps:$4 sm:$0x33]   ;;  %v37_v13 = vld [vmem:[%s941_s0 + $0x50] sm:$0xff]  ;;  %v41_v16 = vpack.c.bf16 %v30_v12, %v29_v11 }
   0x4   :  { %594 = vmatprep.subr.bf16.mxu1 %v667_v0  ;;  %626 = vmatprep.subr.bf16.mxu0 %v667_v0  ;;  %v44_v8 = vpack.c.bf16 %v36_v7, %v35_v6  ;;  %v663_v9 = vld [vmem:[%s942_s3] sm:$0xff]   ;;  %v38_v14 = vld [vmem:[%s941_s0 + $0x58] sm:$0xff]  ;;  %v238_v15 = vsel %vm236_vm3, %v664_v10, 0  ;;  %v32_v19 = vld [vmem:[%s941_s0 + $0x28] sm:$0xff] }
   0x5   :  { %v45_v17 = vpack.c.bf16 %v38_v14, %v37_v13  ;;  %v31_v18 = vld [vmem:[%s941_s0 + $0x20] sm:$0xff]  ;;  %v33_v23 = vld [vmem:[%s941_s0 + $0x30] sm:$0xff]  ;;  %v34_v24 = vld [vmem:[%s941_s0 + $0x38] sm:$0xff] }
   0x6   :  { %567 = vmatmul.mubr.msk.bf16.vlgmr.msra.gmra.mrb[0].mxu0 %vm61_vm2, %v40_v5  ;;  %583 = vmatmul.mubr.msk.bf16.vlgmr.msra.gmra.mrb[0].mxu1 %vm61_vm2, %v44_v8  ;;  %v39_v20 = vld [vmem:[%s941_s0 + $0x60] sm:$0xff]  ;;  %v42_v21 = vpack.c.bf16 %v32_v19, %v31_v18  ;;  %v43_v25 = vpack.c.bf16 %v34_v24, %v33_v23  ;;  %v666_v27 = vld [vmem:[%s943_s5 + $0x8] ss:$0 sps:$4 sm:$0x33]  }
   0x7   :  { %570 = vmatprep.mubr.msk.bf16.mxu0 %vm668_vm1, %v667_v0  ;;  %586 = vmatprep.mubr.msk.bf16.mxu1 %vm668_vm1, %v667_v0  ;;  %v46_v22 = vpack.c.bf16 %v39_v20, %v39_v20  ;;  %v665_v26 = vld [vmem:[%s943_s5] sm:$0xff]   ;;  %v389_v28 = vsel %vm236_vm3, %v666_v27, 0 }
   0x8   :  { %595 = vmatpush3.bf16.msra.mxu1 %v663_v9  ;;  %627 = vmatpush3.bf16.msra.mxu0 %v665_v26  ;;  %v799_v29 = vld [vmem:[%s944_s2] ss:$0 sm:$0xff] }
   0x9   :  { %596 = vmatprep.subr.bf16.mxu1 %v667_v0  ;;  %628 = vmatprep.subr.bf16.mxu0 %v667_v0 }
   0xc   :  { %597 = vmatpush3.bf16.msra.mxu1 %v238_v15  ;;  %629 = vmatpush3.bf16.msra.mxu0 %v389_v28  ;;  %v836_v28 = vld [vmem:[%s945_s4] ss:$0 sm:$0xff] }
   0xe   :  { %571 = vmatmul.mubr.msk.bf16.gmra.mrb[4].mxu0 %vm61_vm2, %v41_v16  ;;  %587 = vmatmul.mubr.msk.bf16.gmra.mrb[4].mxu1 %vm61_vm2, %v45_v17 }
   0xf   :  { %574 = vmatprep.mubr.msk.bf16.mxu0 %vm668_vm1, %v667_v0  ;;  %590 = vmatprep.mubr.msk.bf16.mxu1 %vm668_vm1, %v667_v0 }
  0x16   :  { %575 = vmatmul.mubr.msk.bf16.gmra.mrb[8].mxu0 %vm61_vm2, %v42_v21  ;;  %591 = vmatmul.mubr.msk.bf16.gmra.mrb[8].mxu1 %vm61_vm2, %v46_v22 }
  0x17   :  { %578 = vmatprep.mubr.msk.bf16.mxu0 %vm668_vm1, %v667_v0  ;;  %598 = vmatprep.mubr.msk.bf16.mxu1 %vm668_vm1, %v667_v0 }
  0x1e   :  { %579 = vmatmul.mubr.msk.bf16.gmra.mrb[12].mxu0 %vm61_vm2, %v43_v25 }
  0x1f   :  { %630 = vmatprep.mubr.msk.bf16.mxu0 %vm668_vm1, %v667_v0 }
  0xd9   :  { %v121_v30 = vpop.f32.mrb[0].mxu0  ;;  %v153_v33 = vpop.f32.mrb[0].mxu1 }
  0xda   :  { %v122_v31 = vadd.f32 %v799_v29, %v121_v30  ;;  %v568_v32 = vpop.f32.mrb[1].mxu0  ;;  %v154_v35 = vadd.f32 %v799_v29, %v153_v33  ;;  %v584_v36 = vpop.f32.mrb[1].mxu1 }
  0xdb   :  { %v124_v34 = vpop.f32.mrb[2].mxu0  ;;  %v156_v39 = vpop.f32.mrb[2].mxu1 }
  0xdc   :  { %v125_v37 = vadd.f32 %v799_v29, %v124_v34  ;;  %v569_v38 = vpop.f32.mrb[3].mxu0  ;;  %v183_v40 = vmax.f32 %v154_v35, 0.0  ;;  %v157_v41 = vadd.f32 %v799_v29, %v156_v39  ;;  %v585_v42 = vpop.f32.mrb[3].mxu1  ;;  %v175_v43 = vmax.f32 %v122_v31, 0.0 }
  0xde   :  { %v176_v44 = vmax.f32 %v125_v37, 0.0  ;;  %v184_v45 = vmax.f32 %v157_v41, 0.0 }
  0xe0   :  { %v188_v46 = vpack.c.bf16 %v176_v44, %v175_v43  ;;  %v192_v48 = vpack.c.bf16 %v184_v45, %v183_v40 }
  0xe1   :  { %v129_v47 = vpop.f32.mrb[4].mxu0  ;;  %v161_v51 = vpop.f32.mrb[4].mxu1 }
  0xe2   :  { %v130_v49 = vadd.f32 %v799_v29, %v129_v47  ;;  %v572_v50 = vpop.f32.mrb[5].mxu0  ;;  %599 = vmatmul.mubr.msk.bf16.vlgmr.msra.gmra.mrb[12].mxu1 %vm214_vm4, %v188_v46  ;;  %v162_v53 = vadd.f32 %v799_v29, %v161_v51  ;;  %v588_v54 = vpop.f32.mrb[5].mxu1 }
  0xe3   :  { %v132_v52 = vpop.f32.mrb[6].mxu0  ;;  %602 = vmatprep.mubr.msk.bf16.mxu1 %vm668_vm1, %v667_v0  ;;  %v164_v57 = vpop.f32.mrb[6].mxu1 }
  0xe4   :  { %v133_v55 = vadd.f32 %v799_v29, %v132_v52  ;;  %v573_v56 = vpop.f32.mrb[7].mxu0  ;;  %v185_v58 = vmax.f32 %v162_v53, 0.0  ;;  %v165_v59 = vadd.f32 %v799_v29, %v164_v57  ;;  %v589_v60 = vpop.f32.mrb[7].mxu1  ;;  %v177_v61 = vmax.f32 %v130_v49, 0.0 }
  0xe6   :  { %v178_v62 = vmax.f32 %v133_v55, 0.0  ;;  %v186_v63 = vmax.f32 %v165_v59, 0.0 }
  0xe8   :  { %v189_v1 = vpack.c.bf16 %v178_v62, %v177_v61  ;;  %v193_v3 = vpack.c.bf16 %v186_v63, %v185_v58 }
  0xe9   :  { %v137_v2 = vpop.f32.mrb[8].mxu0  ;;  %v169_v6 = vpop.f32.mrb[8].mxu1 }
  0xea   :  { %v138_v4 = vadd.f32 %v799_v29, %v137_v2  ;;  %v576_v5 = vpop.f32.mrb[9].mxu0  ;;  %603 = vmatmul.mubr.msk.bf16.gmra.mrb[16].mxu1 %vm214_vm4, %v189_v1  ;;  %v592_v8 = vpop.f32.mrb[9].mxu1  ;;  %v170_v25 = vadd.f32 %v799_v29, %v169_v6 }
  0xeb   :  { %v140_v7 = vpop.f32.mrb[10].mxu0  ;;  %606 = vmatprep.mubr.msk.bf16.mxu1 %vm668_vm1, %v667_v0  ;;  %v172_v11 = vpop.f32.mrb[10].mxu1 }
  0xec   :  { %v141_v9 = vadd.f32 %v799_v29, %v140_v7  ;;  %v577_v10 = vpop.f32.mrb[11].mxu0  ;;  %v593_v12 = vpop.f32.mrb[11].mxu1  ;;  %v179_v13 = vmax.f32 %v138_v4, 0.0  ;;  %v187_v26 = vmax.f32 %v170_v25, 0.0 }
  0xee   :  { %v180_v14 = vmax.f32 %v141_v9, 0.0  ;;  %v194_v27 = vpack.c.bf16 %v187_v26, %v187_v26 }
  0xf0   :  { %v190_v15 = vpack.c.bf16 %v180_v14, %v179_v13 }
  0xf1   :  { %v145_v16 = vpop.f32.mrb[12].mxu0 }
  0xf2   :  { %v146_v17 = vadd.f32 %v799_v29, %v145_v16  ;;  %v580_v18 = vpop.f32.mrb[13].mxu0  ;;  %607 = vmatmul.mubr.msk.bf16.gmra.mrb[20].mxu1 %vm214_vm4, %v190_v15 }
  0xf3   :  { %v148_v19 = vpop.f32.mrb[14].mxu0  ;;  %610 = vmatprep.mubr.msk.bf16.mxu1 %vm668_vm1, %v667_v0 }
  0xf4   :  { %v149_v20 = vadd.f32 %v799_v29, %v148_v19  ;;  %v581_v21 = vpop.f32.mrb[15].mxu0  ;;  %v181_v22 = vmax.f32 %v146_v17, 0.0 }
  0xf6   :  { %v182_v23 = vmax.f32 %v149_v20, 0.0 }
  0xf8   :  { %v191_v24 = vpack.c.bf16 %v182_v23, %v181_v22 }
  0xfa   :  { %611 = vmatmul.mubr.msk.bf16.gmra.mrb[24].mxu1 %vm214_vm4, %v191_v24 }
  0xfb   :  { %614 = vmatprep.mubr.msk.bf16.mxu1 %vm668_vm1, %v667_v0 }
 0x102   :  { %615 = vmatmul.mubr.msk.bf16.gmra.mrb[28].mxu1 %vm214_vm4, %v192_v48 }
 0x103   :  { %618 = vmatprep.mubr.msk.bf16.mxu1 %vm668_vm1, %v667_v0 }
 0x10a   :  { %619 = vmatmul.mubr.msk.bf16.gmra.mrb[32].mxu1 %vm214_vm4, %v193_v3 }
 0x10b   :  { %622 = vmatprep.mubr.msk.bf16.mxu1 %vm668_vm1, %v667_v0 }
 0x112   :  { %623 = vmatmul.mubr.msk.bf16.gmra.mrb[36].mxu1 %vm214_vm4, %v194_v27  ;;  %v873_v27 = vld [vmem:[%s946_s6] ss:$0 sm:$0xff] }
 0x1b5   :  { %v274_v30 = vpop.f32.mrb[12].mxu1 }
 0x1b6   :  { %v275_v31 = vadd.f32 %v836_v28, %v274_v30  ;;  %v600_v32 = vpop.f32.mrb[13].mxu1 }
 0x1b7   :  { %v277_v33 = vpop.f32.mrb[14].mxu1 }
 0x1b8   :  { %v278_v29 = vadd.f32 %v836_v28, %v277_v33  ;;  %v601_v34 = vpop.f32.mrb[15].mxu1  ;;  %v328_v35 = vmax.f32 %v275_v31, 0.0 }
 0x1ba   :  { %v329_v36 = vmax.f32 %v278_v29, 0.0 }
 0x1bc   :  { %v341_v37 = vpack.c.bf16 %v329_v36, %v328_v35 }
 0x1bd   :  { %v282_v38 = vpop.f32.mrb[16].mxu1 }
 0x1be   :  { %v283_v39 = vadd.f32 %v836_v28, %v282_v38  ;;  %v604_v40 = vpop.f32.mrb[17].mxu1  ;;  %631 = vmatmul.mubr.msk.bf16.vlgmr.msra.gmra.mrb[16].mxu0 %vm214_vm4, %v341_v37 }
 0x1bf   :  { %v285_v41 = vpop.f32.mrb[18].mxu1  ;;  %634 = vmatprep.mubr.msk.bf16.mxu0 %vm668_vm1, %v667_v0 }
 0x1c0   :  { %v286_v42 = vadd.f32 %v836_v28, %v285_v41  ;;  %v605_v43 = vpop.f32.mrb[19].mxu1  ;;  %v330_v44 = vmax.f32 %v283_v39, 0.0 }
 0x1c2   :  { %v331_v45 = vmax.f32 %v286_v42, 0.0 }
 0x1c4   :  { %v342_v46 = vpack.c.bf16 %v331_v45, %v330_v44 }
 0x1c5   :  { %v290_v47 = vpop.f32.mrb[20].mxu1 }
 0x1c6   :  { %v291_v48 = vadd.f32 %v836_v28, %v290_v47  ;;  %v608_v49 = vpop.f32.mrb[21].mxu1  ;;  %635 = vmatmul.mubr.msk.bf16.gmra.mrb[20].mxu0 %vm214_vm4, %v342_v46 }
 0x1c7   :  { %v293_v50 = vpop.f32.mrb[22].mxu1  ;;  %638 = vmatprep.mubr.msk.bf16.mxu0 %vm668_vm1, %v667_v0 }
 0x1c8   :  { %v294_v51 = vadd.f32 %v836_v28, %v293_v50  ;;  %v609_v52 = vpop.f32.mrb[23].mxu1  ;;  %v332_v53 = vmax.f32 %v291_v48, 0.0 }
 0x1ca   :  { %v333_v54 = vmax.f32 %v294_v51, 0.0 }
 0x1cc   :  { %v343_v55 = vpack.c.bf16 %v333_v54, %v332_v53 }
 0x1cd   :  { %v298_v56 = vpop.f32.mrb[24].mxu1 }
 0x1ce   :  { %v299_v57 = vadd.f32 %v836_v28, %v298_v56  ;;  %v612_v58 = vpop.f32.mrb[25].mxu1  ;;  %639 = vmatmul.mubr.msk.bf16.gmra.mrb[24].mxu0 %vm214_vm4, %v343_v55 }
 0x1cf   :  { %v301_v59 = vpop.f32.mrb[26].mxu1  ;;  %642 = vmatprep.mubr.msk.bf16.mxu0 %vm668_vm1, %v667_v0 }
 0x1d0   :  { %v302_v60 = vadd.f32 %v836_v28, %v301_v59  ;;  %v613_v61 = vpop.f32.mrb[27].mxu1  ;;  %v334_v62 = vmax.f32 %v299_v57, 0.0 }
 0x1d2   :  { %v335_v63 = vmax.f32 %v302_v60, 0.0 }
 0x1d4   :  { %v344_v1 = vpack.c.bf16 %v335_v63, %v334_v62 }
 0x1d5   :  { %v306_v2 = vpop.f32.mrb[28].mxu1 }
 0x1d6   :  { %v307_v3 = vadd.f32 %v836_v28, %v306_v2  ;;  %v616_v4 = vpop.f32.mrb[29].mxu1  ;;  %643 = vmatmul.mubr.msk.bf16.gmra.mrb[28].mxu0 %vm214_vm4, %v344_v1 }
 0x1d7   :  { %v309_v5 = vpop.f32.mrb[30].mxu1  ;;  %646 = vmatprep.mubr.msk.bf16.mxu0 %vm668_vm1, %v667_v0 }
 0x1d8   :  { %v310_v6 = vadd.f32 %v836_v28, %v309_v5  ;;  %v617_v7 = vpop.f32.mrb[31].mxu1  ;;  %v336_v8 = vmax.f32 %v307_v3, 0.0 }
 0x1da   :  { %v337_v9 = vmax.f32 %v310_v6, 0.0 }
 0x1dc   :  { %v345_v10 = vpack.c.bf16 %v337_v9, %v336_v8 }
 0x1dd   :  { %v314_v11 = vpop.f32.mrb[32].mxu1 }
 0x1de   :  { %v315_v12 = vadd.f32 %v836_v28, %v314_v11  ;;  %v620_v13 = vpop.f32.mrb[33].mxu1  ;;  %647 = vmatmul.mubr.msk.bf16.gmra.mrb[32].mxu0 %vm214_vm4, %v345_v10 }
 0x1df   :  { %v317_v14 = vpop.f32.mrb[34].mxu1  ;;  %650 = vmatprep.mubr.msk.bf16.mxu0 %vm668_vm1, %v667_v0 }
 0x1e0   :  { %v318_v15 = vadd.f32 %v836_v28, %v317_v14  ;;  %v621_v16 = vpop.f32.mrb[35].mxu1  ;;  %v338_v17 = vmax.f32 %v315_v12, 0.0 }
 0x1e2   :  { %v339_v18 = vmax.f32 %v318_v15, 0.0 }
 0x1e4   :  { %v346_v19 = vpack.c.bf16 %v339_v18, %v338_v17 }
 0x1e5   :  { %v322_v20 = vpop.f32.mrb[36].mxu1 }
 0x1e6   :  { %v323_v21 = vadd.f32 %v836_v28, %v322_v20  ;;  %v624_v22 = vpop.f32.mrb[37].mxu1  ;;  %651 = vmatmul.mubr.msk.bf16.gmra.mrb[36].mxu0 %vm214_vm4, %v346_v19 }
 0x1e7   :  { %v325_v23 = vpop.f32.mrb[38].mxu1  ;;  %654 = vmatprep.mubr.msk.bf16.mxu0 %vm668_vm1, %v667_v0 }
 0x1e8   :  { %v340_v24 = vmax.f32 %v323_v21, 0.0  ;;  %v625_v25 = vpop.f32.mrb[39].mxu1 }
 0x1ea   :  { %v347_v26 = vpack.c.bf16 %v340_v24, %v340_v24 }
 0x1ee   :  { %655 = vmatmul.mubr.msk.bf16.gmra.mrb[40].mxu0 %vm214_vm4, %v347_v26 }
 0x291   :  { %v425_v30 = vpop.f32.mrb[16].mxu0 }
 0x292   :  { %v426_v28 = vadd.f32 %v873_v27, %v425_v30  ;;  %v632_v31 = vpop.f32.mrb[17].mxu0 }
 0x293   :  { %v428_v32 = vpop.f32.mrb[18].mxu0 }
 0x294   :  { %v479_v33 = vmax.f32 %v426_v28, 0.0  ;;  %v429_v29 = vadd.f32 %v873_v27, %v428_v32  ;;  %v633_v34 = vpop.f32.mrb[19].mxu0 }
 0x296   :  { %492 = vst.msk [vmem:[%s947_s7] sm:$0xff] %vm61_vm2, %v479_v33  ;;  %v480_v0 = vmax.f32 %v429_v29, 0.0 }
 0x298   :  { %493 = vst.msk [vmem:[%s947_s7 + $0x8] sm:$0xff] %vm61_vm2, %v480_v0 }
 0x299   :  { %v433_v35 = vpop.f32.mrb[20].mxu0 }
 0x29a   :  { %v434_v36 = vadd.f32 %v873_v27, %v433_v35  ;;  %v636_v37 = vpop.f32.mrb[21].mxu0 }
 0x29b   :  { %v436_v38 = vpop.f32.mrb[22].mxu0 }
 0x29c   :  { %v481_v39 = vmax.f32 %v434_v36, 0.0  ;;  %v437_v40 = vadd.f32 %v873_v27, %v436_v38  ;;  %v637_v41 = vpop.f32.mrb[23].mxu0 }
 0x29e   :  { %494 = vst.msk [vmem:[%s947_s7 + $0x10] sm:$0xff] %vm61_vm2, %v481_v39  ;;  %v482_v42 = vmax.f32 %v437_v40, 0.0 }
 0x2a0   :  { %495 = vst.msk [vmem:[%s947_s7 + $0x18] sm:$0xff] %vm61_vm2, %v482_v42 }
 0x2a1   :  { %v441_v43 = vpop.f32.mrb[24].mxu0 }
 0x2a2   :  { %v442_v44 = vadd.f32 %v873_v27, %v441_v43  ;;  %v640_v45 = vpop.f32.mrb[25].mxu0 }
 0x2a3   :  { %v444_v46 = vpop.f32.mrb[26].mxu0 }
 0x2a4   :  { %v483_v47 = vmax.f32 %v442_v44, 0.0  ;;  %v445_v48 = vadd.f32 %v873_v27, %v444_v46  ;;  %v641_v49 = vpop.f32.mrb[27].mxu0 }
 0x2a6   :  { %496 = vst.msk [vmem:[%s947_s7 + $0x20] sm:$0xff] %vm61_vm2, %v483_v47  ;;  %v484_v50 = vmax.f32 %v445_v48, 0.0 }
 0x2a8   :  { %497 = vst.msk [vmem:[%s947_s7 + $0x28] sm:$0xff] %vm61_vm2, %v484_v50 }
 0x2a9   :  { %v449_v51 = vpop.f32.mrb[28].mxu0 }
 0x2aa   :  { %v450_v52 = vadd.f32 %v873_v27, %v449_v51  ;;  %v644_v53 = vpop.f32.mrb[29].mxu0 }
 0x2ab   :  { %v452_v54 = vpop.f32.mrb[30].mxu0 }
 0x2ac   :  { %v485_v55 = vmax.f32 %v450_v52, 0.0  ;;  %v453_v56 = vadd.f32 %v873_v27, %v452_v54  ;;  %v645_v57 = vpop.f32.mrb[31].mxu0 }
 0x2ae   :  { %498 = vst.msk [vmem:[%s947_s7 + $0x30] sm:$0xff] %vm61_vm2, %v485_v55  ;;  %v486_v58 = vmax.f32 %v453_v56, 0.0 }
 0x2b0   :  { %499 = vst.msk [vmem:[%s947_s7 + $0x38] sm:$0xff] %vm61_vm2, %v486_v58 }
 0x2b1   :  { %v457_v59 = vpop.f32.mrb[32].mxu0 }
 0x2b2   :  { %v458_v60 = vadd.f32 %v873_v27, %v457_v59  ;;  %v648_v61 = vpop.f32.mrb[33].mxu0 }
 0x2b3   :  { %v460_v62 = vpop.f32.mrb[34].mxu0 }
 0x2b4   :  { %v487_v63 = vmax.f32 %v458_v60, 0.0  ;;  %v461_v1 = vadd.f32 %v873_v27, %v460_v62  ;;  %v649_v2 = vpop.f32.mrb[35].mxu0 }
 0x2b6   :  { %500 = vst.msk [vmem:[%s947_s7 + $0x40] sm:$0xff] %vm61_vm2, %v487_v63  ;;  %v488_v3 = vmax.f32 %v461_v1, 0.0 }
 0x2b8   :  { %501 = vst.msk [vmem:[%s947_s7 + $0x48] sm:$0xff] %vm61_vm2, %v488_v3 }
 0x2b9   :  { %v465_v4 = vpop.f32.mrb[36].mxu0 }
 0x2ba   :  { %v466_v5 = vadd.f32 %v873_v27, %v465_v4  ;;  %v652_v6 = vpop.f32.mrb[37].mxu0 }
 0x2bb   :  { %v468_v7 = vpop.f32.mrb[38].mxu0 }
 0x2bc   :  { %v489_v8 = vmax.f32 %v466_v5, 0.0  ;;  %v469_v9 = vadd.f32 %v873_v27, %v468_v7  ;;  %v653_v10 = vpop.f32.mrb[39].mxu0 }
 0x2be   :  { %502 = vst.msk [vmem:[%s947_s7 + $0x50] sm:$0xff] %vm61_vm2, %v489_v8  ;;  %v490_v11 = vmax.f32 %v469_v9, 0.0 }
 0x2c0   :  { %503 = vst.msk [vmem:[%s947_s7 + $0x58] sm:$0xff] %vm61_vm2, %v490_v11 }
 0x2c1   :  { %v473_v12 = vpop.f32.mrb[40].mxu0 }
 0x2c2   :  { %v474_v13 = vadd.f32 %v873_v27, %v473_v12  ;;  %v656_v14 = vpop.f32.mrb[41].mxu0 }
 0x2c3   :  { %v476_v15 = vpop.f32.mrb[42].mxu0 }
 0x2c4   :  { %v491_v16 = vmax.f32 %v474_v13, 0.0  ;;  %v657_v17 = vpop.f32.mrb[43].mxu0 }
 0x2c6   :  { %504 = vst.msk [vmem:[%s947_s7 + $0x60] sm:$0xff] %vm61_vm2, %v491_v16 }

</bundles_post_ra>
